<compile_context>
chip_gen: v6e
topology: v6e:2x2x1
jax: 0.10.0
libtpu: 0.0.40
codegen_flags: <defaults>
</compile_context>

<pallas_src>
import jax
import jax.numpy as jnp
from jax.experimental import pallas as pl
from jax.experimental.pallas import tpu as pltpu

# ----------------------------- hyper-parameters ------------------------------
B = 8          # batch
S = 8          # sequence length
E = 32         # embedding_dim
H = 32         # hidden_dim
OUT = 4        # out_size
VOCAB = 16


# --------------------------------- kernel ------------------------------------
def olstm_kernel(idx_ref, table_ref, w_hh_ref, w_out_ref, b_out_ref, o_ref):
    # idx_ref:   (S*B, 1) int32 time-major token ids (rows t*B:(t+1)*B = step t)
    # table_ref: (VOCAB, 4H) f32  precomputed  emb @ W_ih + b  per vocab entry
    # w_hh_ref:  (H, 4H) bf16,  w_out_ref: (H, OUT) f32,  b_out_ref: (1, OUT) f32

    # In-kernel "gather": one-hot (S*B, VOCAB) x (VOCAB, 4H) -> all gate
    # pre-activations for every timestep in one prologue MXU push (bias is
    # already folded into the table rows).
    idx = idx_ref[...]                                                  # (S*B, 1)
    vocab_iota = jax.lax.broadcasted_iota(jnp.int32, (S * B, VOCAB), 1)
    onehot = (idx == vocab_iota).astype(jnp.float32)                    # (S*B, VOCAB)
    gx = jnp.dot(onehot, table_ref[...],
                 preferred_element_type=jnp.float32)                    # (S*B, 4H)

    w_hh = w_hh_ref[...]                                                # (H, 4H) bf16
    h = jnp.zeros((B, H), jnp.float32)
    c = jnp.zeros((B, H), jnp.float32)

    for t in range(S):                      # static unroll, S is tiny
        # bf16 x bf16 -> f32 recurrent matmul on the serial critical path.
        g = gx[t * B:(t + 1) * B, :] + jnp.dot(
            h.astype(jnp.bfloat16), w_hh,
            preferred_element_type=jnp.float32)                         # (B, 4H)
        # Two full-vreg EUP activations, then take the needed lane blocks.
        sig = jax.nn.sigmoid(g)
        th = jnp.tanh(g)
        i_g = sig[:, 0 * H:1 * H]
        f_g = sig[:, 1 * H:2 * H]
        g_g = th[:, 2 * H:3 * H]
        o_g = sig[:, 3 * H:4 * H]
        c = f_g * c + i_g * g_g
        h = o_g * jnp.tanh(c)

    out = jnp.dot(h, w_out_ref[...],
                  preferred_element_type=jnp.float32) + b_out_ref[...]  # (B, OUT)
    o_ref[...] = out


# --------------------------------- wrapper ------------------------------------
def _full_spec(shape):
    nd = len(shape)
    return pl.BlockSpec(shape, lambda i, _nd=nd: (0,) * _nd)


def pack_params(p):
    """One-time, input-independent packing of the PyTorch parameters."""
    hi = jax.lax.Precision.HIGHEST
    return {
        # Per-vocab-entry gate pre-activations: emb @ W_ih + (b_ih + b_hh).
        "gx_table": (jnp.dot(p["emb"], p["w_ih"], precision=hi)
                     + p["b"]).astype(jnp.float32),        # (VOCAB, 4H)
        "w_hh": p["w_hh"].astype(jnp.bfloat16),             # (H, 4H)
        "w_out": p["w_out"],                                 # (H, OUT)
        "b_out": p["b_out"],                                 # (1, OUT)
    }


def olstm_forward(X, packed):
    """X: (B, S) int32 token indices; packed: output of pack_params."""
    assert B % 8 == 0, "B must be a multiple of 8 for sublane-aligned gx slices"
    # Tiny (B,S) int32 transpose: time-major flat ids, row t*B + b = X[b, t].
    x_idx = X.T.reshape(S * B, 1).astype(jnp.int32)

    operands = [x_idx, packed["gx_table"], packed["w_hh"],
                packed["w_out"], packed["b_out"]]

    out = pl.pallas_call(
        olstm_kernel,
        out_shape=jax.ShapeDtypeStruct((B, OUT), jnp.float32),
        grid_spec=pltpu.PrefetchScalarGridSpec(
            num_scalar_prefetch=0,
            grid=(1,),
            in_specs=[_full_spec(a.shape) for a in operands],
            out_specs=pl.BlockSpec((B, OUT), lambda i: (0, 0)),
        ),
        compiler_params=pltpu.CompilerParams(
            dimension_semantics=("arbitrary",)),
    )(*operands)
    return out                                                # (B, OUT)


# --------------------------- pure-JAX reference --------------------------------
def reference_forward(X, p):
    hi = jax.lax.Precision.HIGHEST
    emb = jnp.take(p["emb"], X, axis=0).astype(jnp.float32)   # (B, S, E)
    xs = emb.transpose(1, 0, 2)                               # (S, B, E)

    def step(carry, xt):
        h, c = carry
        g = (jnp.dot(xt, p["w_ih"], precision=hi)
             + jnp.dot(h, p["w_hh"], precision=hi) + p["b"])
        i_g = jax.nn.sigmoid(g[:, :H])
        f_g = jax.nn.sigmoid(g[:, H:2 * H])
        g_g = jnp.tanh(g[:, 2 * H:3 * H])
        o_g = jax.nn.sigmoid(g[:, 3 * H:])
        c = f_g * c + i_g * g_g
        h = o_g * jnp.tanh(c)
        return (h, c), None

    h0 = jnp.zeros((B, H), jnp.float32)
    c0 = jnp.zeros((B, H), jnp.float32)
    (h, _), _ = jax.lax.scan(step, (h0, c0), xs)
    return jnp.dot(h, p["w_out"], precision=hi) + p["b_out"]  # (B, OUT)


# ----------------------------------- main --------------------------------------
def make_params(key):
    ks = jax.random.split(key, 6)

    def rnd(k, shape, scale=0.1):
        return jax.random.normal(k, shape, jnp.float32) * scale

    # LSTM weights stored pre-transposed as (in, 4H), gate order i,f,g,o;
    # the two LSTM biases are pre-summed; Linear weight stored as (H, OUT).
    return {
        "emb":   rnd(ks[0], (VOCAB, E), 0.3),
        "w_ih":  rnd(ks[1], (E, 4 * H)),
        "w_hh":  rnd(ks[2], (H, 4 * H)),
        "b":     rnd(ks[3], (1, 4 * H)),
        "w_out": rnd(ks[4], (H, OUT)),
        "b_out": rnd(ks[5], (1, OUT)),
    }


if __name__ == "__main__":
    key = jax.random.PRNGKey(0)
    kp, kx = jax.random.split(key)
    params = make_params(kp)
    packed = pack_params(params)          # one-time, input-independent

    X = jax.random.randint(kx, (B, S), 0, VOCAB, dtype=jnp.int32)

    out = jax.block_until_ready(olstm_forward(X, packed))
    assert out.shape == (B, OUT), out.shape

    ref = jax.block_until_ready(reference_forward(X, params))
    assert jnp.allclose(out, ref, rtol=2e-2, atol=2e-2), (
        f"max abs diff {jnp.max(jnp.abs(out - ref))}")

    print("KERNEL_OK")
</pallas_src>

<mosaic_0001>
module attributes {stable_mosaic.version = 11 : i64} {
  func.func @olstm_kernel(%arg0: i32, %arg1: memref<64x1xi32, #tpu.memory_space<vmem>>, %arg2: memref<16x128xf32, #tpu.memory_space<vmem>>, %arg3: memref<32x128xbf16, #tpu.memory_space<vmem>>, %arg4: memref<32x4xf32, #tpu.memory_space<vmem>>, %arg5: memref<1x4xf32, #tpu.memory_space<vmem>>, %arg6: memref<8x4xf32, #tpu.memory_space<vmem>>) attributes {dimension_semantics = [#tpu.dimension_semantics<arbitrary>], iteration_bounds = array<i64: 1>, scalar_prefetch = 0 : i64, scratch_operands = 0 : i64, tpu.core_type = #tpu.core_type<tc>, window_params = [{pipeline_mode = #tpu.pipeline_mode<synchronous>, transform_indices = @transform_0, window_bounds = array<i64: 64, 1>}, {pipeline_mode = #tpu.pipeline_mode<synchronous>, transform_indices = @transform_1, window_bounds = array<i64: 16, 128>}, {pipeline_mode = #tpu.pipeline_mode<synchronous>, transform_indices = @transform_2, window_bounds = array<i64: 32, 128>}, {pipeline_mode = #tpu.pipeline_mode<synchronous>, transform_indices = @transform_3, window_bounds = array<i64: 32, 4>}, {pipeline_mode = #tpu.pipeline_mode<synchronous>, transform_indices = @transform_4, window_bounds = array<i64: 1, 4>}, {pipeline_mode = #tpu.pipeline_mode<synchronous>, transform_indices = @transform_5, window_bounds = array<i64: 8, 4>}]} {
    %c0 = arith.constant 0 : index
    %c0_0 = arith.constant 0 : index
    %0 = vector.load %arg1[%c0, %c0_0] : memref<64x1xi32, #tpu.memory_space<vmem>>, vector<64x1xi32>
    %1 = tpu.iota {dimensions = array<i32: 1>} : vector<64x16xi32>
    %2 = vector.broadcast %0 : vector<64x1xi32> to vector<64x16xi32>
    %3 = arith.cmpi eq, %2, %1 : vector<64x16xi32>
    %4 = arith.extui %3 : vector<64x16xi1> to vector<64x16xi32>
    %5 = arith.sitofp %4 : vector<64x16xi32> to vector<64x16xf32>
    %c0_1 = arith.constant 0 : index
    %c0_2 = arith.constant 0 : index
    %6 = vector.load %arg2[%c0_1, %c0_2] : memref<16x128xf32, #tpu.memory_space<vmem>>, vector<16x128xf32>
    %cst = arith.constant dense<0.000000e+00> : vector<64x128xf32>
    %7 = tpu.matmul %5, %6, %cst {dimension_numbers = #tpu.dot_dimension_numbers<[1], [0], [0], [1], [0, 0, 1, 1], [], []>} : vector<64x16xf32>, vector<16x128xf32>, vector<64x128xf32> -> vector<64x128xf32>
    %c0_3 = arith.constant 0 : index
    %c0_4 = arith.constant 0 : index
    %8 = vector.load %arg3[%c0_3, %c0_4] : memref<32x128xbf16, #tpu.memory_space<vmem>>, vector<32x128xbf16>
    %cst_5 = arith.constant 0.000000e+00 : f32
    %9 = vector.broadcast %cst_5 : f32 to vector<8x32xf32>
    %cst_6 = arith.constant 0.000000e+00 : f32
    %10 = vector.broadcast %cst_6 : f32 to vector<8x32xf32>
    %11 = vector.extract_strided_slice %7 {offsets = [0, 0], sizes = [8, 128], strides = [1, 1]} : vector<64x128xf32> to vector<8x128xf32>
    %12 = arith.truncf %9 : vector<8x32xf32> to vector<8x32xbf16>
    %cst_7 = arith.constant dense<0.000000e+00> : vector<8x128xf32>
    %13 = tpu.matmul %12, %8, %cst_7 {dimension_numbers = #tpu.dot_dimension_numbers<[1], [0], [0], [1], [0, 0, 1, 1], [], []>} : vector<8x32xbf16>, vector<32x128xbf16>, vector<8x128xf32> -> vector<8x128xf32>
    %14 = arith.addf %11, %13 : vector<8x128xf32>
    %15 = arith.negf %14 : vector<8x128xf32>
    %16 = math.exp %15 : vector<8x128xf32>
    %cst_8 = arith.constant 1.000000e+00 : f32
    %17 = vector.broadcast %cst_8 : f32 to vector<8x128xf32>
    %18 = arith.addf %17, %16 : vector<8x128xf32>
    %19 = arith.divf %17, %18 : vector<8x128xf32>
    %20 = math.tanh %14 : vector<8x128xf32>
    %21 = vector.extract_strided_slice %19 {offsets = [0, 0], sizes = [8, 32], strides = [1, 1]} : vector<8x128xf32> to vector<8x32xf32>
    %22 = vector.extract_strided_slice %19 {offsets = [0, 32], sizes = [8, 32], strides = [1, 1]} : vector<8x128xf32> to vector<8x32xf32>
    %23 = vector.extract_strided_slice %20 {offsets = [0, 64], sizes = [8, 32], strides = [1, 1]} : vector<8x128xf32> to vector<8x32xf32>
    %24 = vector.extract_strided_slice %19 {offsets = [0, 96], sizes = [8, 32], strides = [1, 1]} : vector<8x128xf32> to vector<8x32xf32>
    %25 = arith.mulf %22, %10 : vector<8x32xf32>
    %26 = arith.mulf %21, %23 : vector<8x32xf32>
    %27 = arith.addf %25, %26 : vector<8x32xf32>
    %28 = math.tanh %27 : vector<8x32xf32>
    %29 = arith.mulf %24, %28 : vector<8x32xf32>
    %30 = vector.extract_strided_slice %7 {offsets = [8, 0], sizes = [8, 128], strides = [1, 1]} : vector<64x128xf32> to vector<8x128xf32>
    %31 = arith.truncf %29 : vector<8x32xf32> to vector<8x32xbf16>
    %cst_9 = arith.constant dense<0.000000e+00> : vector<8x128xf32>
    %32 = tpu.matmul %31, %8, %cst_9 {dimension_numbers = #tpu.dot_dimension_numbers<[1], [0], [0], [1], [0, 0, 1, 1], [], []>} : vector<8x32xbf16>, vector<32x128xbf16>, vector<8x128xf32> -> vector<8x128xf32>
    %33 = arith.addf %30, %32 : vector<8x128xf32>
    %34 = arith.negf %33 : vector<8x128xf32>
    %35 = math.exp %34 : vector<8x128xf32>
    %cst_10 = arith.constant 1.000000e+00 : f32
    %36 = vector.broadcast %cst_10 : f32 to vector<8x128xf32>
    %37 = arith.addf %36, %35 : vector<8x128xf32>
    %38 = arith.divf %36, %37 : vector<8x128xf32>
    %39 = math.tanh %33 : vector<8x128xf32>
    %40 = vector.extract_strided_slice %38 {offsets = [0, 0], sizes = [8, 32], strides = [1, 1]} : vector<8x128xf32> to vector<8x32xf32>
    %41 = vector.extract_strided_slice %38 {offsets = [0, 32], sizes = [8, 32], strides = [1, 1]} : vector<8x128xf32> to vector<8x32xf32>
    %42 = vector.extract_strided_slice %39 {offsets = [0, 64], sizes = [8, 32], strides = [1, 1]} : vector<8x128xf32> to vector<8x32xf32>
    %43 = vector.extract_strided_slice %38 {offsets = [0, 96], sizes = [8, 32], strides = [1, 1]} : vector<8x128xf32> to vector<8x32xf32>
    %44 = arith.mulf %41, %27 : vector<8x32xf32>
    %45 = arith.mulf %40, %42 : vector<8x32xf32>
    %46 = arith.addf %44, %45 : vector<8x32xf32>
    %47 = math.tanh %46 : vector<8x32xf32>
    %48 = arith.mulf %43, %47 : vector<8x32xf32>
    %49 = vector.extract_strided_slice %7 {offsets = [16, 0], sizes = [8, 128], strides = [1, 1]} : vector<64x128xf32> to vector<8x128xf32>
    %50 = arith.truncf %48 : vector<8x32xf32> to vector<8x32xbf16>
    %cst_11 = arith.constant dense<0.000000e+00> : vector<8x128xf32>
    %51 = tpu.matmul %50, %8, %cst_11 {dimension_numbers = #tpu.dot_dimension_numbers<[1], [0], [0], [1], [0, 0, 1, 1], [], []>} : vector<8x32xbf16>, vector<32x128xbf16>, vector<8x128xf32> -> vector<8x128xf32>
    %52 = arith.addf %49, %51 : vector<8x128xf32>
    %53 = arith.negf %52 : vector<8x128xf32>
    %54 = math.exp %53 : vector<8x128xf32>
    %cst_12 = arith.constant 1.000000e+00 : f32
    %55 = vector.broadcast %cst_12 : f32 to vector<8x128xf32>
    %56 = arith.addf %55, %54 : vector<8x128xf32>
    %57 = arith.divf %55, %56 : vector<8x128xf32>
    %58 = math.tanh %52 : vector<8x128xf32>
    %59 = vector.extract_strided_slice %57 {offsets = [0, 0], sizes = [8, 32], strides = [1, 1]} : vector<8x128xf32> to vector<8x32xf32>
    %60 = vector.extract_strided_slice %57 {offsets = [0, 32], sizes = [8, 32], strides = [1, 1]} : vector<8x128xf32> to vector<8x32xf32>
    %61 = vector.extract_strided_slice %58 {offsets = [0, 64], sizes = [8, 32], strides = [1, 1]} : vector<8x128xf32> to vector<8x32xf32>
    %62 = vector.extract_strided_slice %57 {offsets = [0, 96], sizes = [8, 32], strides = [1, 1]} : vector<8x128xf32> to vector<8x32xf32>
    %63 = arith.mulf %60, %46 : vector<8x32xf32>
    %64 = arith.mulf %59, %61 : vector<8x32xf32>
    %65 = arith.addf %63, %64 : vector<8x32xf32>
    %66 = math.tanh %65 : vector<8x32xf32>
    %67 = arith.mulf %62, %66 : vector<8x32xf32>
    %68 = vector.extract_strided_slice %7 {offsets = [24, 0], sizes = [8, 128], strides = [1, 1]} : vector<64x128xf32> to vector<8x128xf32>
    %69 = arith.truncf %67 : vector<8x32xf32> to vector<8x32xbf16>
    %cst_13 = arith.constant dense<0.000000e+00> : vector<8x128xf32>
    %70 = tpu.matmul %69, %8, %cst_13 {dimension_numbers = #tpu.dot_dimension_numbers<[1], [0], [0], [1], [0, 0, 1, 1], [], []>} : vector<8x32xbf16>, vector<32x128xbf16>, vector<8x128xf32> -> vector<8x128xf32>
    %71 = arith.addf %68, %70 : vector<8x128xf32>
    %72 = arith.negf %71 : vector<8x128xf32>
    %73 = math.exp %72 : vector<8x128xf32>
    %cst_14 = arith.constant 1.000000e+00 : f32
    %74 = vector.broadcast %cst_14 : f32 to vector<8x128xf32>
    %75 = arith.addf %74, %73 : vector<8x128xf32>
    %76 = arith.divf %74, %75 : vector<8x128xf32>
    %77 = math.tanh %71 : vector<8x128xf32>
    %78 = vector.extract_strided_slice %76 {offsets = [0, 0], sizes = [8, 32], strides = [1, 1]} : vector<8x128xf32> to vector<8x32xf32>
    %79 = vector.extract_strided_slice %76 {offsets = [0, 32], sizes = [8, 32], strides = [1, 1]} : vector<8x128xf32> to vector<8x32xf32>
    %80 = vector.extract_strided_slice %77 {offsets = [0, 64], sizes = [8, 32], strides = [1, 1]} : vector<8x128xf32> to vector<8x32xf32>
    %81 = vector.extract_strided_slice %76 {offsets = [0, 96], sizes = [8, 32], strides = [1, 1]} : vector<8x128xf32> to vector<8x32xf32>
    %82 = arith.mulf %79, %65 : vector<8x32xf32>
    %83 = arith.mulf %78, %80 : vector<8x32xf32>
    %84 = arith.addf %82, %83 : vector<8x32xf32>
    %85 = math.tanh %84 : vector<8x32xf32>
    %86 = arith.mulf %81, %85 : vector<8x32xf32>
    %87 = vector.extract_strided_slice %7 {offsets = [32, 0], sizes = [8, 128], strides = [1, 1]} : vector<64x128xf32> to vector<8x128xf32>
    %88 = arith.truncf %86 : vector<8x32xf32> to vector<8x32xbf16>
    %cst_15 = arith.constant dense<0.000000e+00> : vector<8x128xf32>
    %89 = tpu.matmul %88, %8, %cst_15 {dimension_numbers = #tpu.dot_dimension_numbers<[1], [0], [0], [1], [0, 0, 1, 1], [], []>} : vector<8x32xbf16>, vector<32x128xbf16>, vector<8x128xf32> -> vector<8x128xf32>
    %90 = arith.addf %87, %89 : vector<8x128xf32>
    %91 = arith.negf %90 : vector<8x128xf32>
    %92 = math.exp %91 : vector<8x128xf32>
    %cst_16 = arith.constant 1.000000e+00 : f32
    %93 = vector.broadcast %cst_16 : f32 to vector<8x128xf32>
    %94 = arith.addf %93, %92 : vector<8x128xf32>
    %95 = arith.divf %93, %94 : vector<8x128xf32>
    %96 = math.tanh %90 : vector<8x128xf32>
    %97 = vector.extract_strided_slice %95 {offsets = [0, 0], sizes = [8, 32], strides = [1, 1]} : vector<8x128xf32> to vector<8x32xf32>
    %98 = vector.extract_strided_slice %95 {offsets = [0, 32], sizes = [8, 32], strides = [1, 1]} : vector<8x128xf32> to vector<8x32xf32>
    %99 = vector.extract_strided_slice %96 {offsets = [0, 64], sizes = [8, 32], strides = [1, 1]} : vector<8x128xf32> to vector<8x32xf32>
    %100 = vector.extract_strided_slice %95 {offsets = [0, 96], sizes = [8, 32], strides = [1, 1]} : vector<8x128xf32> to vector<8x32xf32>
    %101 = arith.mulf %98, %84 : vector<8x32xf32>
    %102 = arith.mulf %97, %99 : vector<8x32xf32>
    %103 = arith.addf %101, %102 : vector<8x32xf32>
    %104 = math.tanh %103 : vector<8x32xf32>
    %105 = arith.mulf %100, %104 : vector<8x32xf32>
    %106 = vector.extract_strided_slice %7 {offsets = [40, 0], sizes = [8, 128], strides = [1, 1]} : vector<64x128xf32> to vector<8x128xf32>
    %107 = arith.truncf %105 : vector<8x32xf32> to vector<8x32xbf16>
    %cst_17 = arith.constant dense<0.000000e+00> : vector<8x128xf32>
    %108 = tpu.matmul %107, %8, %cst_17 {dimension_numbers = #tpu.dot_dimension_numbers<[1], [0], [0], [1], [0, 0, 1, 1], [], []>} : vector<8x32xbf16>, vector<32x128xbf16>, vector<8x128xf32> -> vector<8x128xf32>
    %109 = arith.addf %106, %108 : vector<8x128xf32>
    %110 = arith.negf %109 : vector<8x128xf32>
    %111 = math.exp %110 : vector<8x128xf32>
    %cst_18 = arith.constant 1.000000e+00 : f32
    %112 = vector.broadcast %cst_18 : f32 to vector<8x128xf32>
    %113 = arith.addf %112, %111 : vector<8x128xf32>
    %114 = arith.divf %112, %113 : vector<8x128xf32>
    %115 = math.tanh %109 : vector<8x128xf32>
    %116 = vector.extract_strided_slice %114 {offsets = [0, 0], sizes = [8, 32], strides = [1, 1]} : vector<8x128xf32> to vector<8x32xf32>
    %117 = vector.extract_strided_slice %114 {offsets = [0, 32], sizes = [8, 32], strides = [1, 1]} : vector<8x128xf32> to vector<8x32xf32>
    %118 = vector.extract_strided_slice %115 {offsets = [0, 64], sizes = [8, 32], strides = [1, 1]} : vector<8x128xf32> to vector<8x32xf32>
    %119 = vector.extract_strided_slice %114 {offsets = [0, 96], sizes = [8, 32], strides = [1, 1]} : vector<8x128xf32> to vector<8x32xf32>
    %120 = arith.mulf %117, %103 : vector<8x32xf32>
    %121 = arith.mulf %116, %118 : vector<8x32xf32>
    %122 = arith.addf %120, %121 : vector<8x32xf32>
    %123 = math.tanh %122 : vector<8x32xf32>
    %124 = arith.mulf %119, %123 : vector<8x32xf32>
    %125 = vector.extract_strided_slice %7 {offsets = [48, 0], sizes = [8, 128], strides = [1, 1]} : vector<64x128xf32> to vector<8x128xf32>
    %126 = arith.truncf %124 : vector<8x32xf32> to vector<8x32xbf16>
    %cst_19 = arith.constant dense<0.000000e+00> : vector<8x128xf32>
    %127 = tpu.matmul %126, %8, %cst_19 {dimension_numbers = #tpu.dot_dimension_numbers<[1], [0], [0], [1], [0, 0, 1, 1], [], []>} : vector<8x32xbf16>, vector<32x128xbf16>, vector<8x128xf32> -> vector<8x128xf32>
    %128 = arith.addf %125, %127 : vector<8x128xf32>
    %129 = arith.negf %128 : vector<8x128xf32>
    %130 = math.exp %129 : vector<8x128xf32>
    %cst_20 = arith.constant 1.000000e+00 : f32
    %131 = vector.broadcast %cst_20 : f32 to vector<8x128xf32>
    %132 = arith.addf %131, %130 : vector<8x128xf32>
    %133 = arith.divf %131, %132 : vector<8x128xf32>
    %134 = math.tanh %128 : vector<8x128xf32>
    %135 = vector.extract_strided_slice %133 {offsets = [0, 0], sizes = [8, 32], strides = [1, 1]} : vector<8x128xf32> to vector<8x32xf32>
    %136 = vector.extract_strided_slice %133 {offsets = [0, 32], sizes = [8, 32], strides = [1, 1]} : vector<8x128xf32> to vector<8x32xf32>
    %137 = vector.extract_strided_slice %134 {offsets = [0, 64], sizes = [8, 32], strides = [1, 1]} : vector<8x128xf32> to vector<8x32xf32>
    %138 = vector.extract_strided_slice %133 {offsets = [0, 96], sizes = [8, 32], strides = [1, 1]} : vector<8x128xf32> to vector<8x32xf32>
    %139 = arith.mulf %136, %122 : vector<8x32xf32>
    %140 = arith.mulf %135, %137 : vector<8x32xf32>
    %141 = arith.addf %139, %140 : vector<8x32xf32>
    %142 = math.tanh %141 : vector<8x32xf32>
    %143 = arith.mulf %138, %142 : vector<8x32xf32>
    %144 = vector.extract_strided_slice %7 {offsets = [56, 0], sizes = [8, 128], strides = [1, 1]} : vector<64x128xf32> to vector<8x128xf32>
    %145 = arith.truncf %143 : vector<8x32xf32> to vector<8x32xbf16>
    %cst_21 = arith.constant dense<0.000000e+00> : vector<8x128xf32>
    %146 = tpu.matmul %145, %8, %cst_21 {dimension_numbers = #tpu.dot_dimension_numbers<[1], [0], [0], [1], [0, 0, 1, 1], [], []>} : vector<8x32xbf16>, vector<32x128xbf16>, vector<8x128xf32> -> vector<8x128xf32>
    %147 = arith.addf %144, %146 : vector<8x128xf32>
    %148 = arith.negf %147 : vector<8x128xf32>
    %149 = math.exp %148 : vector<8x128xf32>
    %cst_22 = arith.constant 1.000000e+00 : f32
    %150 = vector.broadcast %cst_22 : f32 to vector<8x128xf32>
    %151 = arith.addf %150, %149 : vector<8x128xf32>
    %152 = arith.divf %150, %151 : vector<8x128xf32>
    %153 = math.tanh %147 : vector<8x128xf32>
    %154 = vector.extract_strided_slice %152 {offsets = [0, 0], sizes = [8, 32], strides = [1, 1]} : vector<8x128xf32> to vector<8x32xf32>
    %155 = vector.extract_strided_slice %152 {offsets = [0, 32], sizes = [8, 32], strides = [1, 1]} : vector<8x128xf32> to vector<8x32xf32>
    %156 = vector.extract_strided_slice %153 {offsets = [0, 64], sizes = [8, 32], strides = [1, 1]} : vector<8x128xf32> to vector<8x32xf32>
    %157 = vector.extract_strided_slice %152 {offsets = [0, 96], sizes = [8, 32], strides = [1, 1]} : vector<8x128xf32> to vector<8x32xf32>
    %158 = arith.mulf %155, %141 : vector<8x32xf32>
    %159 = arith.mulf %154, %156 : vector<8x32xf32>
    %160 = arith.addf %158, %159 : vector<8x32xf32>
    %161 = math.tanh %160 : vector<8x32xf32>
    %162 = arith.mulf %157, %161 : vector<8x32xf32>
    %c0_23 = arith.constant 0 : index
    %c0_24 = arith.constant 0 : index
    %163 = vector.load %arg4[%c0_23, %c0_24] : memref<32x4xf32, #tpu.memory_space<vmem>>, vector<32x4xf32>
    %cst_25 = arith.constant dense<0.000000e+00> : vector<8x4xf32>
    %164 = tpu.matmul %162, %163, %cst_25 {dimension_numbers = #tpu.dot_dimension_numbers<[1], [0], [0], [1], [0, 0, 1, 1], [], []>} : vector<8x32xf32>, vector<32x4xf32>, vector<8x4xf32> -> vector<8x4xf32>
    %c0_26 = arith.constant 0 : index
    %c0_27 = arith.constant 0 : index
    %165 = vector.load %arg5[%c0_26, %c0_27] : memref<1x4xf32, #tpu.memory_space<vmem>>, vector<1x4xf32>
    %166 = vector.broadcast %165 : vector<1x4xf32> to vector<8x4xf32>
    %167 = arith.addf %164, %166 : vector<8x4xf32>
    %c0_28 = arith.constant 0 : index
    %c0_29 = arith.constant 0 : index
    %168 = vector.load %arg6[%c0_28, %c0_29] : memref<8x4xf32, #tpu.memory_space<vmem>>, vector<8x4xf32>
    tpu.vector_store %arg6[%c0_28, %c0_29], %167 {strides = array<i32>} : memref<8x4xf32, #tpu.memory_space<vmem>>, vector<8x4xf32>,
    return
  }
  func.func @transform_0(%arg0: i32) -> (i32, i32) {
    %c0_i32 = arith.constant 0 : i32
    %c0_i32_0 = arith.constant 0 : i32
    %c0_i32_1 = arith.constant 0 : i32
    return %c0_i32, %c0_i32_0 : i32, i32
  }
  func.func @transform_1(%arg0: i32) -> (i32, i32) {
    %c0_i32 = arith.constant 0 : i32
    %c0_i32_0 = arith.constant 0 : i32
    %c0_i32_1 = arith.constant 0 : i32
    return %c0_i32, %c0_i32_0 : i32, i32
  }
  func.func @transform_2(%arg0: i32) -> (i32, i32) {
    %c0_i32 = arith.constant 0 : i32
    %c0_i32_0 = arith.constant 0 : i32
    %c0_i32_1 = arith.constant 0 : i32
    return %c0_i32, %c0_i32_0 : i32, i32
  }
  func.func @transform_3(%arg0: i32) -> (i32, i32) {
    %c0_i32 = arith.constant 0 : i32
    %c0_i32_0 = arith.constant 0 : i32
    %c0_i32_1 = arith.constant 0 : i32
    return %c0_i32, %c0_i32_0 : i32, i32
  }
  func.func @transform_4(%arg0: i32) -> (i32, i32) {
    %c0_i32 = arith.constant 0 : i32
    %c0_i32_0 = arith.constant 0 : i32
    %c0_i32_1 = arith.constant 0 : i32
    return %c0_i32, %c0_i32_0 : i32, i32
  }
  func.func @transform_5(%arg0: i32) -> (i32, i32) {
    %c0_i32 = arith.constant 0 : i32
    %c0_i32_0 = arith.constant 0 : i32
    %c0_i32_1 = arith.constant 0 : i32
    return %c0_i32, %c0_i32_0 : i32, i32
  }
}

</mosaic_0001>

<bundles_post_ra>
// kernel: tpu_custom_call.1
= control target key start
LH: loop header
LB: loop body
LE: loop exit
PB: predicated region body
PF: predicated region fallthrough
CT: control target
= control target key end

     0   :  { %v1130_v0 = vmov 0   ;;  %v1131_v2 = vmov 0.0   ;;  %vm1132_vm0 = vmmov 0   ;;  %v29_v8 = vlaneseq  ;;  %s1359_s0 = inlined_call_operand.vmem [shape: s32[64,1], index: 0, kind: input, shape index: {}]   ;;  %s1360_s2 = inlined_call_operand.vmem [shape: bf16[32,128], index: 2, kind: input, shape index: {}]   ;;  %s1361_s1 = inlined_call_operand.vmem [shape: f32[16,128], index: 1, kind: input, shape index: {}]   ;;  %s1362_s3 = inlined_call_operand.vmem [shape: f32[32,4], index: 3, kind: input, shape index: {}]   ;;  %s1363_s4 = inlined_call_operand.vmem [shape: f32[1,4], index: 4, kind: input, shape index: {}]   ;;  %s1364_s5 = inlined_call_operand.vmem [shape: f32[8,4], index: 5, kind: output, shape index: {}]  }
   0x1   :  { %1062 = vset.pattern.permute.xlu0 %v1130_v0  ;;  %v21_v1 = vld [vmem:[%s1359_s0] sm:$0xff]  ;;  %982 = vmatprep.subr.bf16.mxu1 %v1131_v2  ;;  %v1172_v3 = vld [vmem:[%s1360_s2 + $0x8] sm:$0xff]   ;;  %vm81_vm1 = vcmask 130048   ;;  %vm227_vm4 = vcmask 261120   ;;  %v23_v48 = vld [vmem:[%s1359_s0 + $0x10] sm:$0xff]  ;;  %vm886_vm11 = vcmask 31744  }
   0x2   :  { %32 = vperm.xlu0 %1062, %v21_v1   ;;  %986 = vmatprep.mubr.msk.bf16.mxu1 %vm1132_vm0, %v1131_v2  ;;  %v22_v4 = vld [vmem:[%s1359_s0 + $0x8] sm:$0xff]  ;;  %v1186_v6 = vld [vmem:[%s1360_s2] sm:$0xff]   ;;  %v1201_v9 = vand.u32 127, %v29_v8  ;;  %s1134_s2 = smov 32   ;;  %v27_v50 = vld [vmem:[%s1359_s0 + $0x30] sm:$0xff] }
   0x3   :  { %v80_v5 = vld [vmem:[%s1361_s1 + $0x8] sm:$0xff]  ;;  %1063 = vset.pattern.permute.xlu1 %v1130_v0  ;;  %983 = vmatpush3.bf16.msra.mxu1 %v1172_v3  ;;  %v79_v7 = vld [vmem:[%s1361_s1] sm:$0xff]  ;;  %s1133_s1 = smov 64   ;;  %v24_v57 = vld [vmem:[%s1359_s0 + $0x18] sm:$0xff] }
   0x4   :  { %966 = vmatprep.subr.mxu0 %v80_v5  ;;  %984 = vmatprep.subr.bf16.mxu1 %v1131_v2  ;;  %v25_v49 = vld [vmem:[%s1359_s0 + $0x20] sm:$0xff]  ;;  %v26_v58 = vld [vmem:[%s1359_s0 + $0x28] sm:$0xff]  ;;  %v28_v59 = vld [vmem:[%s1359_s0 + $0x38] sm:$0xff] }
   0x5   :  { %967 = vmatpush3.msra.mxu0 %v80_v5 }
   0x6   :  { %35 = vperm.xlu0 %1062, %v22_v4   ;;  %968 = vmatprep.subr.mxu0 %v79_v7 }
   0x7   :  { %969 = vmatpush3.msra.mxu0 %v79_v7  ;;  %985 = vmatpush3.bf16.msra.mxu1 %v1186_v6 }
   0x8   :  { %998 = vmatprep.subr.bf16.mxu0 %v1131_v2  ;;  %990 = vmatprep.subr.bf16.mxu1 %v1131_v2 }
   0xa   :  { %987 = vmatmul.mubr.bf16.vlgmr.msra.gmra.mxu1 %v1130_v0 }
   0xb   :  { %991 = vmatpush3.bf16.msra.mxu1 %v1172_v3  ;;  %994 = vmatprep.mubr.msk.bf16.mxu1 %vm1132_vm0, %v1131_v2 }
   0xc   :  { %992 = vmatprep.subr.bf16.mxu1 %v1131_v2 }
   0xf   :  { %993 = vmatpush3.bf16.msra.mxu1 %v1186_v6 }
  0x10   :  { %1006 = vmatprep.subr.bf16.mxu1 %v1131_v2 }
  0x7d   :  { %v33_v10 = vpop.permute.xlu0 %32 }
  0x7e   :  { %vm55_vm2 = vcmp.eq.s32.totalorder %v33_v10, %v1201_v9 }
  0x7f   :  { %v892_v11 = vsel %vm55_vm2, 1.0, %v1131_v2 }
  0x80   :  { %970 = vmatprep.mubr.msk.f32.mxu0 %vm81_vm1, %v892_v11 }
  0x81   :  { %v36_v12 = vpop.permute.xlu0 %35 }
  0x82   :  { %vm56_vm3 = vcmp.eq.s32.totalorder %v36_v12, %v1201_v9 }
  0x83   :  { %v893_v13 = vsel %vm56_vm3, 1.0, %v1131_v2 }
  0x84   :  { %971 = vmatmul.mubr.msk.f32.vlgmr.msra.gmra.mxu0 %vm81_vm1, %v893_v13 }
  0x85   :  { %999 = vmatpush3.bf16.msra.mxu0 %v1172_v3 }
  0x86   :  { %1000 = vmatprep.subr.bf16.mxu0 %v1131_v2 }
  0x89   :  { %1001 = vmatpush3.bf16.msra.mxu0 %v1186_v6 }
  0x8a   :  { %1014 = vmatprep.subr.bf16.mxu0 %v1131_v2 }
  0xca   :  { %v265_v14 = vpop.f32.mrf.mxu1 }
  0xcc   :  { %v988_v15 = vpop.f32.mrf.mxu1 }
  0xce   :  { %v268_v16 = vpop.f32.mrf.mxu1 }
  0xd0   :  { %v989_v17 = vpop.f32.mrf.mxu1 }
 0x144   :  { %v972_v18 = vpop.f32.mrf.mxu0 }
 0x146   :  { %v172_v19 = vpop.f32.mrf.mxu0 }
 0x147   :  { %v271_v20 = vadd.f32 %v265_v14, %v172_v19 }
 0x149   :  { %1066 = vtanh.f32 %v271_v20  ;;  %v910_v22 = vmul.f32 -1.442695, %v271_v20 }
 0x14b   :  { %1068 = vpow2.f32 %v910_v22 }
 0x156   :  { %v1067_v21 = vpop.eup %1066 }
 0x157   :  { %281 = vrot.lane.b32.xlu1 %v1067_v21, %s1133_s1 }
 0x158   :  { %v1069_v23 = vpop.eup %1068 }
 0x159   :  { %v275_v24 = vadd.f32 1.0, %v1069_v23 }
 0x15b   :  { %1070 = vrcp.f32 %v275_v24 }
 0x168   :  { %v1071_v25 = vpop.eup %1070 }
 0x169   :  { %v279_v28 = vmul.f32 0.0, %v1071_v25 }
 0x1c9   :  { %v282_v26 = vpop.permute.xlu1 %281 }
 0x1ca   :  { %v284_v27 = vmul.f32 %v1071_v25, %v282_v26 }
 0x1cc   :  { %286 = vrot.lane.b32.xlu1 %v284_v27, %s1134_s2 }
 0x23e   :  { %v287_v29 = vpop.permute.xlu1 %286 }
 0x23f   :  { %v289_v30 = vadd.f32 %v287_v29, %v279_v28 }
 0x241   :  { %1072 = vtanh.f32 %v289_v30 }
 0x24e   :  { %v1073_v31 = vpop.eup %1072 }
 0x24f   :  { %292 = vrot.lane.b32.xlu0 %v1073_v31, %s1133_s1 }
 0x2c1   :  { %v293_v32 = vpop.permute.xlu0 %292 }
 0x2c2   :  { %v295_v33 = vmul.f32 %v1071_v25, %v293_v32 }
 0x2c4   :  { %v296_v34 = vpack.c.bf16 %v295_v33, %v295_v33 }
 0x2c6   :  { %298 = vrot.lane.b32.xlu1 %v296_v34, %s1134_s2 }
 0x338   :  { %v299_v35 = vpop.permute.xlu1 %298 }
 0x339   :  { %995 = vmatmul.mubr.msk.bf16.vlgmr.msra.gmra.mxu1 %vm227_vm4, %v299_v35 }
 0x33a   :  { %1007 = vmatpush3.bf16.msra.mxu1 %v1172_v3  ;;  %1010 = vmatprep.mubr.msk.bf16.mxu1 %vm1132_vm0, %v1131_v2 }
 0x33b   :  { %1008 = vmatprep.subr.bf16.mxu1 %v1131_v2 }
 0x33e   :  { %1009 = vmatpush3.bf16.msra.mxu1 %v1186_v6 }
 0x33f   :  { %1022 = vmatprep.subr.bf16.mxu1 %v1131_v2 }
 0x3f9   :  { %v337_v36 = vpop.f32.mrf.mxu1 }
 0x3fa   :  { %v343_v37 = vadd.f32 %v972_v18, %v337_v36 }
 0x3fb   :  { %v996_v38 = vpop.f32.mrf.mxu1 }
 0x3fc   :  { %1074 = vtanh.f32 %v343_v37  ;;  %v912_v42 = vmul.f32 -1.442695, %v343_v37 }
 0x3fd   :  { %v340_v39 = vpop.f32.mrf.mxu1 }
 0x3fe   :  { %1076 = vpow2.f32 %v912_v42 }
 0x3ff   :  { %v997_v40 = vpop.f32.mrf.mxu1 }
 0x409   :  { %v1075_v41 = vpop.eup %1074 }
 0x40a   :  { %353 = vrot.lane.b32.xlu0 %v1075_v41, %s1133_s1 }
 0x40b   :  { %v1077_v43 = vpop.eup %1076 }
 0x40c   :  { %v347_v44 = vadd.f32 1.0, %v1077_v43 }
 0x40e   :  { %1078 = vrcp.f32 %v347_v44 }
 0x41b   :  { %v1079_v45 = vpop.eup %1078 }
 0x41c   :  { %v351_v51 = vmul.f32 %v1079_v45, %v289_v30 }
 0x47c   :  { %v354_v46 = vpop.permute.xlu0 %353 }
 0x47d   :  { %v356_v47 = vmul.f32 %v1079_v45, %v354_v46 }
 0x47f   :  { %358 = vrot.lane.b32.xlu1 %v356_v47, %s1134_s2 }
 0x483   :  { %38 = vperm.xlu1 %1063, %v23_v48  }
 0x487   :  { %44 = vperm.xlu1 %1063, %v25_v49  }
 0x48b   :  { %50 = vperm.xlu1 %1063, %v27_v50  }
 0x4f1   :  { %v359_v52 = vpop.permute.xlu1 %358 }
 0x4f2   :  { %v1235_v53 = vadd.f32 %v359_v52, %v351_v51 }
 0x4f4   :  { %1080 = vtanh.f32 %v1235_v53 }
 0x4fe   :  { %v39_v54 = vpop.permute.xlu1 %38 }
 0x4ff   :  { %vm57_vm5 = vcmp.eq.s32.totalorder %v39_v54, %v1201_v9 }
 0x500   :  { %v894_v55 = vsel %vm57_vm5, 1.0, %v1131_v2 }
 0x501   :  { %v1081_v56 = vpop.eup %1080  ;;  %973 = vmatprep.mubr.msk.f32.mxu0 %vm81_vm1, %v894_v55 }
 0x502   :  { %364 = vrot.lane.b32.xlu0 %v1081_v56, %s1133_s1  ;;  %v45_v63 = vpop.permute.xlu1 %44 }
 0x503   :  { %vm59_vm6 = vcmp.eq.s32.totalorder %v45_v63, %v1201_v9 }
 0x504   :  { %v896_v4 = vsel %vm59_vm6, 1.0, %v1131_v2 }
 0x506   :  { %41 = vperm.xlu0 %1062, %v24_v57   ;;  %v51_v0 = vpop.permute.xlu1 %50 }
 0x507   :  { %vm61_vm8 = vcmp.eq.s32.totalorder %v51_v0, %v1201_v9 }
 0x508   :  { %v898_v8 = vsel %vm61_vm8, 1.0, %v1131_v2 }
 0x50a   :  { %47 = vperm.xlu0 %1062, %v26_v58  }
 0x50e   :  { %53 = vperm.xlu0 %1062, %v28_v59  }
 0x574   :  { %v365_v60 = vpop.permute.xlu0 %364 }
 0x575   :  { %v367_v61 = vmul.f32 %v1079_v45, %v365_v60 }
 0x577   :  { %v368_v62 = vpack.c.bf16 %v367_v61, %v367_v61 }
 0x579   :  { %370 = vrot.lane.b32.xlu1 %v368_v62, %s1134_s2 }
 0x581   :  { %v42_v1 = vpop.permute.xlu0 %41 }
 0x582   :  { %vm58_vm7 = vcmp.eq.s32.totalorder %v42_v1, %v1201_v9 }
 0x583   :  { %v895_v5 = vsel %vm58_vm7, 1.0, %v1131_v2 }
 0x584   :  { %974 = vmatmul.mubr.msk.f32.gmra.mxu0 %vm81_vm1, %v895_v5 }
 0x585   :  { %v48_v7 = vpop.permute.xlu0 %47  ;;  %976 = vmatprep.mubr.msk.f32.mxu0 %vm81_vm1, %v896_v4 }
 0x586   :  { %vm60_vm9 = vcmp.eq.s32.totalorder %v48_v7, %v1201_v9 }
 0x587   :  { %v897_v10 = vsel %vm60_vm9, 1.0, %v1131_v2 }
 0x588   :  { %977 = vmatmul.mubr.msk.f32.gmra.mxu0 %vm81_vm1, %v897_v10 }
 0x589   :  { %v54_v11 = vpop.permute.xlu0 %53  ;;  %979 = vmatprep.mubr.msk.f32.mxu0 %vm81_vm1, %v898_v8 }
 0x58a   :  { %vm62_vm10 = vcmp.eq.s32.totalorder %v54_v11, %v1201_v9 }
 0x58b   :  { %v899_v12 = vsel %vm62_vm10, 1.0, %v1131_v2 }
 0x58c   :  { %980 = vmatmul.mubr.msk.f32.gmra.mxu0 %vm81_vm1, %v899_v12 }
 0x58d   :  { %1002 = vmatprep.mubr.msk.bf16.mxu0 %vm1132_vm0, %v1131_v2 }
 0x5eb   :  { %v371_v13 = vpop.permute.xlu1 %370 }
 0x5ec   :  { %1003 = vmatmul.mubr.msk.bf16.vlgmr.msra.gmra.mxu0 %vm227_vm4, %v371_v13 }
 0x5ed   :  { %1015 = vmatpush3.bf16.msra.mxu0 %v1172_v3  ;;  %1018 = vmatprep.mubr.msk.bf16.mxu0 %vm1132_vm0, %v1131_v2 }
 0x5ee   :  { %1016 = vmatprep.subr.bf16.mxu0 %v1131_v2 }
 0x5f1   :  { %1017 = vmatpush3.bf16.msra.mxu0 %v1186_v6 }
 0x5f2   :  { %1030 = vmatprep.subr.bf16.mxu0 %v1131_v2 }
 0x644   :  { %v975_v9 = vpop.f32.mrf.mxu0 }
 0x646   :  { %v182_v14 = vpop.f32.mrf.mxu0 }
 0x648   :  { %v1276_v15 = vpop.f32.mrf.mxu0 }
 0x64a   :  { %v1278_v16 = vpop.f32.mrf.mxu0 }
 0x64c   :  { %v1280_v17 = vpop.f32.mrf.mxu0 }
 0x64e   :  { %v1282_v18 = vpop.f32.mrf.mxu0 }
 0x6ac   :  { %v409_v19 = vpop.f32.mrf.mxu0 }
 0x6ad   :  { %v415_v20 = vadd.f32 %v409_v19, %v182_v14 }
 0x6ae   :  { %v1004_v21 = vpop.f32.mrf.mxu0 }
 0x6af   :  { %1082 = vtanh.f32 %v415_v20  ;;  %v914_v25 = vmul.f32 -1.442695, %v415_v20 }
 0x6b0   :  { %v412_v22 = vpop.f32.mrf.mxu0 }
 0x6b1   :  { %1084 = vpow2.f32 %v914_v25 }
 0x6b2   :  { %v1005_v23 = vpop.f32.mrf.mxu0 }
 0x6bc   :  { %v1083_v24 = vpop.eup %1082 }
 0x6bd   :  { %425 = vrot.lane.b32.xlu0 %v1083_v24, %s1133_s1 }
 0x6be   :  { %v1085_v26 = vpop.eup %1084 }
 0x6bf   :  { %v419_v27 = vadd.f32 1.0, %v1085_v26 }
 0x6c1   :  { %1086 = vrcp.f32 %v419_v27 }
 0x6ce   :  { %v1087_v28 = vpop.eup %1086 }
 0x6cf   :  { %v423_v31 = vmul.f32 %v1087_v28, %v1235_v53 }
 0x72f   :  { %v426_v29 = vpop.permute.xlu0 %425 }
 0x730   :  { %v428_v30 = vmul.f32 %v1087_v28, %v426_v29 }
 0x732   :  { %430 = vrot.lane.b32.xlu1 %v428_v30, %s1134_s2 }
 0x7a4   :  { %v431_v32 = vpop.permute.xlu1 %430 }
 0x7a5   :  { %v433_v33 = vadd.f32 %v431_v32, %v423_v31 }
 0x7a7   :  { %1088 = vtanh.f32 %v433_v33 }
 0x7b4   :  { %v1089_v34 = vpop.eup %1088 }
 0x7b5   :  { %436 = vrot.lane.b32.xlu0 %v1089_v34, %s1133_s1 }
 0x827   :  { %v437_v35 = vpop.permute.xlu0 %436 }
 0x828   :  { %v439_v36 = vmul.f32 %v1087_v28, %v437_v35 }
 0x82a   :  { %v440_v37 = vpack.c.bf16 %v439_v36, %v439_v36 }
 0x82c   :  { %442 = vrot.lane.b32.xlu1 %v440_v37, %s1134_s2 }
 0x89e   :  { %v443_v38 = vpop.permute.xlu1 %442 }
 0x89f   :  { %1011 = vmatmul.mubr.msk.bf16.vlgmr.msra.gmra.mxu1 %vm227_vm4, %v443_v38 }
 0x8a0   :  { %1023 = vmatpush3.bf16.msra.mxu1 %v1172_v3  ;;  %1026 = vmatprep.mubr.msk.bf16.mxu1 %vm1132_vm0, %v1131_v2 }
 0x8a1   :  { %1024 = vmatprep.subr.bf16.mxu1 %v1131_v2 }
 0x8a4   :  { %1025 = vmatpush3.bf16.msra.mxu1 %v1186_v6 }
 0x8a5   :  { %1038 = vmatprep.subr.bf16.mxu1 %v1131_v2 }
 0x95f   :  { %v481_v39 = vpop.f32.mrf.mxu1 }
 0x960   :  { %v487_v40 = vadd.f32 %v975_v9, %v481_v39 }
 0x961   :  { %v1012_v41 = vpop.f32.mrf.mxu1 }
 0x962   :  { %1090 = vtanh.f32 %v487_v40  ;;  %v916_v45 = vmul.f32 -1.442695, %v487_v40 }
 0x963   :  { %v484_v42 = vpop.f32.mrf.mxu1 }
 0x964   :  { %1092 = vpow2.f32 %v916_v45 }
 0x965   :  { %v1013_v43 = vpop.f32.mrf.mxu1 }
 0x96f   :  { %v1091_v44 = vpop.eup %1090 }
 0x970   :  { %497 = vrot.lane.b32.xlu0 %v1091_v44, %s1133_s1 }
 0x971   :  { %v1093_v46 = vpop.eup %1092 }
 0x972   :  { %v491_v47 = vadd.f32 1.0, %v1093_v46 }
 0x974   :  { %1094 = vrcp.f32 %v491_v47 }
 0x981   :  { %v1095_v48 = vpop.eup %1094 }
 0x982   :  { %v495_v51 = vmul.f32 %v1095_v48, %v433_v33 }
 0x9e2   :  { %v498_v49 = vpop.permute.xlu0 %497 }
 0x9e3   :  { %v500_v50 = vmul.f32 %v1095_v48, %v498_v49 }
 0x9e5   :  { %502 = vrot.lane.b32.xlu1 %v500_v50, %s1134_s2 }
 0xa57   :  { %v503_v52 = vpop.permute.xlu1 %502 }
 0xa58   :  { %v505_v53 = vadd.f32 %v503_v52, %v495_v51 }
 0xa5a   :  { %1096 = vtanh.f32 %v505_v53 }
 0xa67   :  { %v1097_v54 = vpop.eup %1096 }
 0xa68   :  { %508 = vrot.lane.b32.xlu0 %v1097_v54, %s1133_s1 }
 0xada   :  { %v509_v55 = vpop.permute.xlu0 %508 }
 0xadb   :  { %v511_v56 = vmul.f32 %v1095_v48, %v509_v55 }
 0xadd   :  { %v512_v57 = vpack.c.bf16 %v511_v56, %v511_v56 }
 0xadf   :  { %514 = vrot.lane.b32.xlu1 %v512_v57, %s1134_s2 }
 0xb51   :  { %v515_v58 = vpop.permute.xlu1 %514 }
 0xb52   :  { %1019 = vmatmul.mubr.msk.bf16.vlgmr.msra.gmra.mxu0 %vm227_vm4, %v515_v58 }
 0xb53   :  { %1031 = vmatpush3.bf16.msra.mxu0 %v1172_v3  ;;  %1034 = vmatprep.mubr.msk.bf16.mxu0 %vm1132_vm0, %v1131_v2 }
 0xb54   :  { %1032 = vmatprep.subr.bf16.mxu0 %v1131_v2 }
 0xb57   :  { %1033 = vmatpush3.bf16.msra.mxu0 %v1186_v6 }
 0xb58   :  { %1046 = vmatprep.subr.mxu0 %v1131_v2 }
 0xc12   :  { %v553_v59 = vpop.f32.mrf.mxu0 }
 0xc13   :  { %v559_v60 = vadd.f32 %v553_v59, %v1278_v16 }
 0xc14   :  { %v1020_v61 = vpop.f32.mrf.mxu0 }
 0xc15   :  { %1098 = vtanh.f32 %v559_v60  ;;  %v918_v1 = vmul.f32 -1.442695, %v559_v60 }
 0xc16   :  { %v556_v62 = vpop.f32.mrf.mxu0 }
 0xc17   :  { %1100 = vpow2.f32 %v918_v1 }
 0xc18   :  { %v1021_v63 = vpop.f32.mrf.mxu0 }
 0xc22   :  { %v1099_v0 = vpop.eup %1098 }
 0xc23   :  { %569 = vrot.lane.b32.xlu0 %v1099_v0, %s1133_s1 }
 0xc24   :  { %v1101_v4 = vpop.eup %1100 }
 0xc25   :  { %v563_v5 = vadd.f32 1.0, %v1101_v4 }
 0xc27   :  { %1102 = vrcp.f32 %v563_v5 }
 0xc34   :  { %v1103_v7 = vpop.eup %1102 }
 0xc35   :  { %v567_v11 = vmul.f32 %v1103_v7, %v505_v53 }
 0xc95   :  { %v570_v8 = vpop.permute.xlu0 %569 }
 0xc96   :  { %v572_v10 = vmul.f32 %v1103_v7, %v570_v8 }
 0xc98   :  { %574 = vrot.lane.b32.xlu1 %v572_v10, %s1134_s2 }
 0xd0a   :  { %v575_v12 = vpop.permute.xlu1 %574 }
 0xd0b   :  { %v577_v13 = vadd.f32 %v575_v12, %v567_v11  ;;  %v803_v11 = vld [vmem:[%s1362_s3 + $0x18] sm:$0xff]  ;;  %v802_v12 = vld [vmem:[%s1362_s3 + $0x10] sm:$0xff] }
 0xd0d   :  { %1104 = vtanh.f32 %v577_v13 }
 0xd1a   :  { %v1105_v9 = vpop.eup %1104 }
 0xd1b   :  { %580 = vrot.lane.b32.xlu0 %v1105_v9, %s1133_s1  ;;  %v800_v9 = vld [vmem:[%s1362_s3] sm:$0xff] }
 0xd8d   :  { %v581_v14 = vpop.permute.xlu0 %580 }
 0xd8e   :  { %v583_v16 = vmul.f32 %v1103_v7, %v581_v14 }
 0xd90   :  { %v584_v19 = vpack.c.bf16 %v583_v16, %v583_v16 }
 0xd92   :  { %586 = vrot.lane.b32.xlu1 %v584_v19, %s1134_s2 }
 0xe04   :  { %v587_v20 = vpop.permute.xlu1 %586 }
 0xe05   :  { %1027 = vmatmul.mubr.msk.bf16.vlgmr.msra.gmra.mxu1 %vm227_vm4, %v587_v20 }
 0xe06   :  { %1039 = vmatpush3.bf16.msra.mxu1 %v1172_v3  ;;  %1042 = vmatprep.mubr.msk.bf16.mxu1 %vm1132_vm0, %v1131_v2 }
 0xe07   :  { %1040 = vmatprep.subr.bf16.mxu1 %v1131_v2 }
 0xe0a   :  { %1041 = vmatpush3.bf16.msra.mxu1 %v1186_v6 }
 0xec5   :  { %v625_v21 = vpop.f32.mrf.mxu1 }
 0xec6   :  { %v631_v22 = vadd.f32 %v1276_v15, %v625_v21  ;;  %v925_v21 = vld [vmem:[%s1363_s4] ss:$0 sm:$0xff] }
 0xec7   :  { %v1028_v23 = vpop.f32.mrf.mxu1 }
 0xec8   :  { %1106 = vtanh.f32 %v631_v22  ;;  %v920_v27 = vmul.f32 -1.442695, %v631_v22 }
 0xec9   :  { %v628_v24 = vpop.f32.mrf.mxu1 }
 0xeca   :  { %1108 = vpow2.f32 %v920_v27 }
 0xecb   :  { %v1029_v25 = vpop.f32.mrf.mxu1 }
 0xed5   :  { %v1107_v26 = vpop.eup %1106 }
 0xed6   :  { %641 = vrot.lane.b32.xlu0 %v1107_v26, %s1133_s1 }
 0xed7   :  { %v1109_v3 = vpop.eup %1108 }
 0xed8   :  { %v635_v28 = vadd.f32 1.0, %v1109_v3 }
 0xeda   :  { %1110 = vrcp.f32 %v635_v28 }
 0xee7   :  { %v1111_v29 = vpop.eup %1110 }
 0xee8   :  { %v639_v6 = vmul.f32 %v1111_v29, %v577_v13  ;;  %v801_v13 = vld [vmem:[%s1362_s3 + $0x8] sm:$0xff] }
 0xf48   :  { %v642_v30 = vpop.permute.xlu0 %641 }
 0xf49   :  { %v644_v31 = vmul.f32 %v1111_v29, %v642_v30 }
 0xf4b   :  { %646 = vrot.lane.b32.xlu1 %v644_v31, %s1134_s2 }
 0xfbd   :  { %v647_v32 = vpop.permute.xlu1 %646 }
 0xfbe   :  { %v649_v15 = vadd.f32 %v647_v32, %v639_v6 }
 0xfc0   :  { %1112 = vtanh.f32 %v649_v15 }
 0xfcd   :  { %v1113_v33 = vpop.eup %1112 }
 0xfce   :  { %652 = vrot.lane.b32.xlu0 %v1113_v33, %s1133_s1 }
0x1040   :  { %v653_v34 = vpop.permute.xlu0 %652 }
0x1041   :  { %v655_v35 = vmul.f32 %v1111_v29, %v653_v34 }
0x1043   :  { %v656_v36 = vpack.c.bf16 %v655_v35, %v655_v35 }
0x1045   :  { %658 = vrot.lane.b32.xlu1 %v656_v36, %s1134_s2 }
0x10b7   :  { %v659_v37 = vpop.permute.xlu1 %658 }
0x10b8   :  { %1035 = vmatmul.mubr.msk.bf16.vlgmr.msra.gmra.mxu0 %vm227_vm4, %v659_v37 }
0x10b9   :  { %1054 = vmatprep.mubr.msk.f32.mxu0 %vm1132_vm0, %v1131_v2  ;;  %1047 = vmatpush3.msra.mxu0 %v803_v11 }
0x10ba   :  { %1048 = vmatprep.subr.mxu0 %v1131_v2 }
0x10bb   :  { %1049 = vmatpush3.msra.mxu0 %v802_v12 }
0x10bc   :  { %1050 = vmatprep.subr.mxu0 %v1131_v2 }
0x10bd   :  { %1051 = vmatpush3.msra.mxu0 %v801_v13 }
0x10be   :  { %1052 = vmatprep.subr.mxu0 %v1131_v2 }
0x10bf   :  { %1053 = vmatpush3.msra.mxu0 %v800_v9 }
0x1178   :  { %v697_v38 = vpop.f32.mrf.mxu0 }
0x1179   :  { %v703_v39 = vadd.f32 %v697_v38, %v1282_v18 }
0x117a   :  { %v1036_v40 = vpop.f32.mrf.mxu0 }
0x117b   :  { %1114 = vtanh.f32 %v703_v39  ;;  %v922_v44 = vmul.f32 -1.442695, %v703_v39 }
0x117c   :  { %v700_v41 = vpop.f32.mrf.mxu0 }
0x117d   :  { %1116 = vpow2.f32 %v922_v44 }
0x117e   :  { %v1037_v42 = vpop.f32.mrf.mxu0 }
0x1188   :  { %v1115_v43 = vpop.eup %1114 }
0x1189   :  { %713 = vrot.lane.b32.xlu0 %v1115_v43, %s1133_s1 }
0x118a   :  { %v1117_v45 = vpop.eup %1116 }
0x118b   :  { %v707_v46 = vadd.f32 1.0, %v1117_v45 }
0x118d   :  { %1118 = vrcp.f32 %v707_v46 }
0x119a   :  { %v1119_v47 = vpop.eup %1118 }
0x119b   :  { %v711_v50 = vmul.f32 %v1119_v47, %v649_v15 }
0x11fb   :  { %v714_v48 = vpop.permute.xlu0 %713 }
0x11fc   :  { %v716_v49 = vmul.f32 %v1119_v47, %v714_v48 }
0x11fe   :  { %718 = vrot.lane.b32.xlu1 %v716_v49, %s1134_s2 }
0x1270   :  { %v719_v51 = vpop.permute.xlu1 %718 }
0x1271   :  { %v721_v18 = vadd.f32 %v719_v51, %v711_v50 }
0x1273   :  { %1120 = vtanh.f32 %v721_v18 }
0x1280   :  { %v1121_v52 = vpop.eup %1120 }
0x1281   :  { %724 = vrot.lane.b32.xlu0 %v1121_v52, %s1133_s1 }
0x12f3   :  { %v725_v53 = vpop.permute.xlu0 %724 }
0x12f4   :  { %v727_v54 = vmul.f32 %v1119_v47, %v725_v53 }
0x12f6   :  { %v728_v55 = vpack.c.bf16 %v727_v54, %v727_v54 }
0x12f8   :  { %730 = vrot.lane.b32.xlu1 %v728_v55, %s1134_s2 }
0x136a   :  { %v731_v56 = vpop.permute.xlu1 %730 }
0x136b   :  { %1043 = vmatmul.mubr.msk.bf16.vlgmr.msra.gmra.mxu1 %vm227_vm4, %v731_v56 }
0x142b   :  { %v769_v57 = vpop.f32.mrf.mxu1 }
0x142c   :  { %v775_v58 = vadd.f32 %v1280_v17, %v769_v57 }
0x142d   :  { %v1044_v59 = vpop.f32.mrf.mxu1 }
0x142e   :  { %1122 = vtanh.f32 %v775_v58  ;;  %v924_v63 = vmul.f32 -1.442695, %v775_v58 }
0x142f   :  { %v772_v60 = vpop.f32.mrf.mxu1 }
0x1430   :  { %1124 = vpow2.f32 %v924_v63 }
0x1431   :  { %v1045_v61 = vpop.f32.mrf.mxu1 }
0x143b   :  { %v1123_v62 = vpop.eup %1122 }
0x143c   :  { %785 = vrot.lane.b32.xlu0 %v1123_v62, %s1133_s1 }
0x143d   :  { %v1125_v0 = vpop.eup %1124 }
0x143e   :  { %v779_v1 = vadd.f32 1.0, %v1125_v0 }
0x1440   :  { %1126 = vrcp.f32 %v779_v1 }
0x144d   :  { %v1127_v4 = vpop.eup %1126 }
0x144e   :  { %v783_v8 = vmul.f32 %v1127_v4, %v721_v18 }
0x14ae   :  { %v786_v5 = vpop.permute.xlu0 %785 }
0x14af   :  { %v788_v7 = vmul.f32 %v1127_v4, %v786_v5 }
0x14b1   :  { %790 = vrot.lane.b32.xlu1 %v788_v7, %s1134_s2 }
0x1523   :  { %v791_v10 = vpop.permute.xlu1 %790 }
0x1524   :  { %v793_v17 = vadd.f32 %v791_v10, %v783_v8 }
0x1526   :  { %1128 = vtanh.f32 %v793_v17 }
0x1533   :  { %v1129_v14 = vpop.eup %1128 }
0x1534   :  { %796 = vrot.lane.b32.xlu0 %v1129_v14, %s1133_s1 }
0x15a6   :  { %v797_v16 = vpop.permute.xlu0 %796 }
0x15a7   :  { %v799_v19 = vmul.f32 %v1127_v4, %v797_v16 }
0x15a9   :  { %812 = vrot.lane.b32.xlu1 %v799_v19, %s1134_s2 }
0x161b   :  { %v813_v20 = vpop.permute.xlu1 %812 }
0x161c   :  { %1055 = vmatmul.mubr.msk.f32.vlgmr.msra.gmra.mxu0 %vm227_vm4, %v813_v20 }
0x16dc   :  { %v882_v22 = vpop.f32.mrf.mxu0 }
0x16dd   :  { %v883_v23 = vadd.f32 %v925_v21, %v882_v22 }
0x16de   :  { %v1056_v24 = vpop.f32.mrf.mxu0 }
0x16df   :  { %887 = vst.msk [vmem:[%s1364_s5] sm:$0xff] %vm886_vm11, %v883_v23 }

</bundles_post_ra>
